<compile_context>
chip_gen: v5e
topology: v5e:2x2
jax: 0.10.0
libtpu: 0.0.40
codegen_flags: <defaults>
</compile_context>

<pallas_src>
import jax
import jax.numpy as jnp
from jax.experimental import pallas as pl
from jax.experimental.pallas import tpu as pltpu

H1 = 256
H2 = 128
EPS = 1e-5           # PyTorch BatchNorm1d default eps
LANE = 128           # TPU lane width
NEG_BIG = -1e30      # bias for padded logit columns -> exp() == 0 in softmax


def _round_up(n, m):
    return ((n + m - 1) // m) * m


def _dqn_kernel(x_ref, w1_ref, b1_ref, w2_ref, b2_ref, w3_ref, b3_ref, o_ref):
    # fc1 (+ folded bn1) + relu      -- bf16 MXU operands, f32 accumulation
    h = jnp.dot(x_ref[...].astype(jnp.bfloat16), w1_ref[...],
                preferred_element_type=jnp.float32) + b1_ref[...]
    h = jnp.maximum(h, 0.0)

    # fc2 (+ folded bn2) + relu      [dropout1 = identity in eval mode]
    h = jnp.dot(h.astype(jnp.bfloat16), w2_ref[...],
                preferred_element_type=jnp.float32) + b2_ref[...]
    h = jnp.maximum(h, 0.0)

    # fc3 (+ folded bn3)             [dropout2 = identity in eval mode]
    logits = jnp.dot(h.astype(jnp.bfloat16), w3_ref[...],
                     preferred_element_type=jnp.float32) + b3_ref[...]

    # softmax over the lane-dense (padded) feature axis; padded columns carry
    # a -1e30 bias so exp() underflows to 0 and the denominator is unchanged.
    m = jnp.max(logits, axis=1, keepdims=True)
    e = jnp.exp(logits - m)
    denom = jnp.sum(e, axis=1, keepdims=True)
    o_ref[...] = e * pl.reciprocal(denom, approx=True)


def dqn_forward(x, kp):
    """x: (B, d_in) float32.  kp: folded/padded kernel params from fold_params."""
    B, d_in = x.shape
    d_in_pad = kp["w1"].shape[0]
    d_out_pad = kp["w3"].shape[1]
    d_out = kp["d_out"]

    # Batch tile: multiple of the f32 sublane (8); 128 for real batch sizes.
    TB = 128 if B >= 128 else _round_up(B, 8)
    B_pad = _round_up(B, TB)

    x_pad = jnp.zeros((B_pad, d_in_pad), jnp.float32).at[:B, :d_in].set(x)

    const = lambda i: (0, 0)  # weights/biases: same block every step -> stay in VMEM

    out = pl.pallas_call(
        _dqn_kernel,
        out_shape=jax.ShapeDtypeStruct((B_pad, d_out_pad), jnp.float32),
        grid=(B_pad // TB,),
        in_specs=[
            pl.BlockSpec((TB, d_in_pad), lambda i: (i, 0)),   # x tile
            pl.BlockSpec((d_in_pad, H1), const),              # w1 (bf16)
            pl.BlockSpec((1, H1), const),                     # b1 (f32)
            pl.BlockSpec((H1, H2), const),                    # w2 (bf16)
            pl.BlockSpec((1, H2), const),                     # b2 (f32)
            pl.BlockSpec((H2, d_out_pad), const),             # w3 (bf16, padded)
            pl.BlockSpec((1, d_out_pad), const),              # b3 (f32, padded)
        ],
        out_specs=pl.BlockSpec((TB, d_out_pad), lambda i: (i, 0)),
        compiler_params=pltpu.CompilerParams(
            dimension_semantics=("parallel",),  # batch tiles shard across TCs (v7x)
        ),
    )(x_pad, kp["w1"], kp["b1"], kp["w2"], kp["b2"], kp["w3"], kp["b3"])

    return out[:B, :d_out]


# ----------------------------------------------------------------------------
# Parameter construction (deterministic, PyTorch-module-shaped) + folding glue
# ----------------------------------------------------------------------------

def init_raw_params(key, input_dim, output_dim):
    """Synthetic parameters matching the PyTorch module (Linear in (in,out) layout)."""
    ks = jax.random.split(key, 18)

    def linear(kw, kb, fan_in, fan_out):
        bound = 1.0 / jnp.sqrt(fan_in)
        w = jax.random.uniform(kw, (fan_in, fan_out), jnp.float32, -bound, bound)
        b = jax.random.uniform(kb, (1, fan_out), jnp.float32, -bound, bound)
        return w, b

    def bn(kg, kb, km, kv, dim):
        gamma = 1.0 + 0.1 * jax.random.normal(kg, (1, dim), jnp.float32)
        beta = 0.1 * jax.random.normal(kb, (1, dim), jnp.float32)
        rmean = 0.1 * jax.random.normal(km, (1, dim), jnp.float32)
        rvar = jax.random.uniform(kv, (1, dim), jnp.float32, 0.5, 1.5)
        return gamma, beta, rmean, rvar

    return dict(
        bn1=bn(ks[0], ks[1], ks[2], ks[3], input_dim),
        fc1=linear(ks[4], ks[5], input_dim, H1),
        bn2=bn(ks[6], ks[7], ks[8], ks[9], H1),
        fc2=linear(ks[10], ks[11], H1, H2),
        bn3=bn(ks[12], ks[13], ks[14], ks[15], H2),
        fc3=linear(ks[16], ks[17], H2, output_dim),
    )


def _bn_scale_shift(bn):
    gamma, beta, rmean, rvar = bn
    s = gamma / jnp.sqrt(rvar + EPS)
    t = beta - rmean * s
    return s, t


def fold_params(raw, input_dim, output_dim):
    """Fold eval-mode BN into the following Linear and pad for TPU lanes.

    fc(bn(h)) = (h*s + t) @ W + b = h @ (s.T * W) + (t @ W + b)
    """
    s1, t1 = _bn_scale_shift(raw["bn1"])
    s2, t2 = _bn_scale_shift(raw["bn2"])
    s3, t3 = _bn_scale_shift(raw["bn3"])
    w1, b1 = raw["fc1"]
    w2, b2 = raw["fc2"]
    w3, b3 = raw["fc3"]

    w1f, b1f = s1.reshape(-1, 1) * w1, t1 @ w1 + b1
    w2f, b2f = s2.reshape(-1, 1) * w2, t2 @ w2 + b2
    w3f, b3f = s3.reshape(-1, 1) * w3, t3 @ w3 + b3

    d_in_pad = _round_up(input_dim, LANE)
    d_out_pad = _round_up(output_dim, LANE)

    # K-pad fc1 with zeros (contribute 0 to the dot); lane-pad the output head
    # with zero weight columns and -1e30 bias so padded logits vanish in softmax.
    w1p = jnp.zeros((d_in_pad, H1), jnp.float32).at[:input_dim].set(w1f)
    w3p = jnp.zeros((H2, d_out_pad), jnp.float32).at[:, :output_dim].set(w3f)
    b3p = jnp.full((1, d_out_pad), NEG_BIG, jnp.float32).at[:, :output_dim].set(b3f)

    return dict(
        w1=w1p.astype(jnp.bfloat16), b1=b1f,
        w2=w2f.astype(jnp.bfloat16), b2=b2f,
        w3=w3p.astype(jnp.bfloat16), b3=b3p,
        d_out=output_dim,
    )


# ----------------------------------------------------------------------------
# Pure-JAX references
# ----------------------------------------------------------------------------

def reference_forward_f32(x, raw):
    """Eval-mode forward of the PyTorch module, all-f32 (semantic reference)."""
    s1, t1 = _bn_scale_shift(raw["bn1"])
    s2, t2 = _bn_scale_shift(raw["bn2"])
    s3, t3 = _bn_scale_shift(raw["bn3"])
    w1, b1 = raw["fc1"]
    w2, b2 = raw["fc2"]
    w3, b3 = raw["fc3"]
    h = x * s1 + t1
    h = jnp.maximum(h @ w1 + b1, 0.0)
    h = h * s2 + t2
    h = jnp.maximum(h @ w2 + b2, 0.0)
    h = h * s3 + t3
    return jax.nn.softmax(h @ w3 + b3, axis=1)


def reference_forward_matched(x, kp):
    """Same math as the kernel (folded BN, bf16 MXU operands, f32 accumulation)."""
    d_in_pad = kp["w1"].shape[0]
    xb = jnp.zeros((x.shape[0], d_in_pad), jnp.float32).at[:, : x.shape[1]].set(x)

    def mm(a, w):
        return jnp.dot(a.astype(jnp.bfloat16), w, preferred_element_type=jnp.float32)

    h = jnp.maximum(mm(xb, kp["w1"]) + kp["b1"], 0.0)
    h = jnp.maximum(mm(h, kp["w2"]) + kp["b2"], 0.0)
    logits = mm(h, kp["w3"]) + kp["b3"]
    return jax.nn.softmax(logits, axis=1)[:, : kp["d_out"]]


if __name__ == "__main__":
    key = jax.random.PRNGKey(0)
    k_x, k_p, k_x2 = jax.random.split(key, 3)

    B, INPUT_DIM, OUTPUT_DIM = 8, 32, 8
    x = jax.random.normal(k_x, (B, INPUT_DIM), jnp.float32)
    raw = init_raw_params(k_p, INPUT_DIM, OUTPUT_DIM)
    kp = fold_params(raw, INPUT_DIM, OUTPUT_DIM)

    out = jax.block_until_ready(dqn_forward(x, kp))
    assert out.shape == (B, OUTPUT_DIM)

    # exact-math parity (same folded/bf16 recipe) and semantic parity (f32 module)
    assert jnp.allclose(out, reference_forward_matched(x, kp),
                        atol=5e-3, rtol=5e-3), "mismatch vs matched JAX reference"
    assert jnp.allclose(out, reference_forward_f32(x, raw),
                        atol=5e-2, rtol=5e-2), "mismatch vs f32 module reference"
    assert jnp.allclose(jnp.sum(out, axis=1), 1.0, atol=1e-2)

    # multi-tile path: grid > 1 with padded batch, weights stay VMEM-resident
    B2 = 136
    x2 = jax.random.normal(k_x2, (B2, INPUT_DIM), jnp.float32)
    out2 = jax.block_until_ready(dqn_forward(x2, kp))
    assert out2.shape == (B2, OUTPUT_DIM)
    assert jnp.allclose(out2, reference_forward_matched(x2, kp),
                        atol=5e-3, rtol=5e-3), "mismatch on multi-tile batch"

    # TODO(synk): training-mode dropout / BatchNorm batch statistics are out of
    # scope; this kernel implements the eval-mode forward only.
    print("KERNEL_OK")
</pallas_src>

<mosaic_0001>
module attributes {stable_mosaic.version = 11 : i64} {
  func.func @_dqn_kernel(%arg0: i32, %arg1: memref<8x128xf32, #tpu.memory_space<vmem>>, %arg2: memref<128x256xbf16, #tpu.memory_space<vmem>>, %arg3: memref<1x256xf32, #tpu.memory_space<vmem>>, %arg4: memref<256x128xbf16, #tpu.memory_space<vmem>>, %arg5: memref<1x128xf32, #tpu.memory_space<vmem>>, %arg6: memref<128x128xbf16, #tpu.memory_space<vmem>>, %arg7: memref<1x128xf32, #tpu.memory_space<vmem>>, %arg8: memref<8x128xf32, #tpu.memory_space<vmem>>) attributes {dimension_semantics = [#tpu.dimension_semantics<parallel>], iteration_bounds = array<i64: 1>, scalar_prefetch = 0 : i64, scratch_operands = 0 : i64, tpu.core_type = #tpu.core_type<tc>, window_params = [{transform_indices = @transform_0, window_bounds = array<i64: 8, 128>}, {pipeline_mode = #tpu.pipeline_mode<synchronous>, transform_indices = @transform_1, window_bounds = array<i64: 128, 256>}, {pipeline_mode = #tpu.pipeline_mode<synchronous>, transform_indices = @transform_2, window_bounds = array<i64: 1, 256>}, {pipeline_mode = #tpu.pipeline_mode<synchronous>, transform_indices = @transform_3, window_bounds = array<i64: 256, 128>}, {pipeline_mode = #tpu.pipeline_mode<synchronous>, transform_indices = @transform_4, window_bounds = array<i64: 1, 128>}, {pipeline_mode = #tpu.pipeline_mode<synchronous>, transform_indices = @transform_5, window_bounds = array<i64: 128, 128>}, {pipeline_mode = #tpu.pipeline_mode<synchronous>, transform_indices = @transform_6, window_bounds = array<i64: 1, 128>}, {transform_indices = @transform_7, window_bounds = array<i64: 8, 128>}]} {
    %c0 = arith.constant 0 : index
    %c0_0 = arith.constant 0 : index
    %0 = vector.load %arg1[%c0, %c0_0] : memref<8x128xf32, #tpu.memory_space<vmem>>, vector<8x128xf32>
    %1 = arith.truncf %0 : vector<8x128xf32> to vector<8x128xbf16>
    %c0_1 = arith.constant 0 : index
    %c0_2 = arith.constant 0 : index
    %2 = vector.load %arg2[%c0_1, %c0_2] : memref<128x256xbf16, #tpu.memory_space<vmem>>, vector<128x256xbf16>
    %cst = arith.constant dense<0.000000e+00> : vector<8x256xf32>
    %3 = tpu.matmul %1, %2, %cst {dimension_numbers = #tpu.dot_dimension_numbers<[1], [0], [0], [1], [0, 0, 1, 1], [], []>} : vector<8x128xbf16>, vector<128x256xbf16>, vector<8x256xf32> -> vector<8x256xf32>
    %c0_3 = arith.constant 0 : index
    %c0_4 = arith.constant 0 : index
    %4 = vector.load %arg3[%c0_3, %c0_4] : memref<1x256xf32, #tpu.memory_space<vmem>>, vector<1x256xf32>
    %5 = vector.broadcast %4 : vector<1x256xf32> to vector<8x256xf32>
    %6 = arith.addf %3, %5 : vector<8x256xf32>
    %cst_5 = arith.constant 0.000000e+00 : f32
    %7 = vector.broadcast %cst_5 : f32 to vector<8x256xf32>
    %8 = arith.maximumf %6, %7 : vector<8x256xf32>
    %9 = arith.truncf %8 : vector<8x256xf32> to vector<8x256xbf16>
    %c0_6 = arith.constant 0 : index
    %c0_7 = arith.constant 0 : index
    %10 = vector.load %arg4[%c0_6, %c0_7] : memref<256x128xbf16, #tpu.memory_space<vmem>>, vector<256x128xbf16>
    %cst_8 = arith.constant dense<0.000000e+00> : vector<8x128xf32>
    %11 = tpu.matmul %9, %10, %cst_8 {dimension_numbers = #tpu.dot_dimension_numbers<[1], [0], [0], [1], [0, 0, 1, 1], [], []>} : vector<8x256xbf16>, vector<256x128xbf16>, vector<8x128xf32> -> vector<8x128xf32>
    %c0_9 = arith.constant 0 : index
    %c0_10 = arith.constant 0 : index
    %12 = vector.load %arg5[%c0_9, %c0_10] : memref<1x128xf32, #tpu.memory_space<vmem>>, vector<1x128xf32>
    %13 = vector.broadcast %12 : vector<1x128xf32> to vector<8x128xf32>
    %14 = arith.addf %11, %13 : vector<8x128xf32>
    %cst_11 = arith.constant 0.000000e+00 : f32
    %15 = vector.broadcast %cst_11 : f32 to vector<8x128xf32>
    %16 = arith.maximumf %14, %15 : vector<8x128xf32>
    %17 = arith.truncf %16 : vector<8x128xf32> to vector<8x128xbf16>
    %c0_12 = arith.constant 0 : index
    %c0_13 = arith.constant 0 : index
    %18 = vector.load %arg6[%c0_12, %c0_13] : memref<128x128xbf16, #tpu.memory_space<vmem>>, vector<128x128xbf16>
    %cst_14 = arith.constant dense<0.000000e+00> : vector<8x128xf32>
    %19 = tpu.matmul %17, %18, %cst_14 {dimension_numbers = #tpu.dot_dimension_numbers<[1], [0], [0], [1], [0, 0, 1, 1], [], []>} : vector<8x128xbf16>, vector<128x128xbf16>, vector<8x128xf32> -> vector<8x128xf32>
    %c0_15 = arith.constant 0 : index
    %c0_16 = arith.constant 0 : index
    %20 = vector.load %arg7[%c0_15, %c0_16] : memref<1x128xf32, #tpu.memory_space<vmem>>, vector<1x128xf32>
    %21 = vector.broadcast %20 : vector<1x128xf32> to vector<8x128xf32>
    %22 = arith.addf %19, %21 : vector<8x128xf32>
    %cst_17 = arith.constant dense<0xFF800000> : vector<8xf32>
    %23 = vector.multi_reduction <maximumf>, %22, %cst_17 [1] : vector<8x128xf32> to vector<8xf32>
    %24 = vector.shape_cast %23 : vector<8xf32> to vector<8x1xf32>
    %25 = vector.broadcast %24 : vector<8x1xf32> to vector<8x128xf32>
    %26 = arith.subf %22, %25 : vector<8x128xf32>
    %27 = math.exp %26 : vector<8x128xf32>
    %cst_18 = arith.constant dense<0.000000e+00> : vector<8xf32>
    %28 = vector.multi_reduction <add>, %27, %cst_18 [1] : vector<8x128xf32> to vector<8xf32>
    %29 = vector.shape_cast %28 : vector<8xf32> to vector<8x1xf32>
    %30 = tpu.reciprocal %29 {approx = true} : vector<8x1xf32> -> vector<8x1xf32>
    %31 = vector.broadcast %30 : vector<8x1xf32> to vector<8x128xf32>
    %32 = arith.mulf %27, %31 : vector<8x128xf32>
    %c0_19 = arith.constant 0 : index
    %c0_20 = arith.constant 0 : index
    %33 = vector.load %arg8[%c0_19, %c0_20] : memref<8x128xf32, #tpu.memory_space<vmem>>, vector<8x128xf32>
    tpu.vector_store %arg8[%c0_19, %c0_20], %32 {strides = array<i32>} : memref<8x128xf32, #tpu.memory_space<vmem>>, vector<8x128xf32>,
    return
  }
  func.func @transform_0(%arg0: i32) -> (i32, i32) {
    %c0_i32 = arith.constant 0 : i32
    %c0_i32_0 = arith.constant 0 : i32
    return %arg0, %c0_i32 : i32, i32
  }
  func.func @transform_1(%arg0: i32) -> (i32, i32) {
    %c0_i32 = arith.constant 0 : i32
    %c0_i32_0 = arith.constant 0 : i32
    %c0_i32_1 = arith.constant 0 : i32
    return %c0_i32, %c0_i32_0 : i32, i32
  }
  func.func @transform_2(%arg0: i32) -> (i32, i32) {
    %c0_i32 = arith.constant 0 : i32
    %c0_i32_0 = arith.constant 0 : i32
    %c0_i32_1 = arith.constant 0 : i32
    return %c0_i32, %c0_i32_0 : i32, i32
  }
  func.func @transform_3(%arg0: i32) -> (i32, i32) {
    %c0_i32 = arith.constant 0 : i32
    %c0_i32_0 = arith.constant 0 : i32
    %c0_i32_1 = arith.constant 0 : i32
    return %c0_i32, %c0_i32_0 : i32, i32
  }
  func.func @transform_4(%arg0: i32) -> (i32, i32) {
    %c0_i32 = arith.constant 0 : i32
    %c0_i32_0 = arith.constant 0 : i32
    %c0_i32_1 = arith.constant 0 : i32
    return %c0_i32, %c0_i32_0 : i32, i32
  }
  func.func @transform_5(%arg0: i32) -> (i32, i32) {
    %c0_i32 = arith.constant 0 : i32
    %c0_i32_0 = arith.constant 0 : i32
    %c0_i32_1 = arith.constant 0 : i32
    return %c0_i32, %c0_i32_0 : i32, i32
  }
  func.func @transform_6(%arg0: i32) -> (i32, i32) {
    %c0_i32 = arith.constant 0 : i32
    %c0_i32_0 = arith.constant 0 : i32
    %c0_i32_1 = arith.constant 0 : i32
    return %c0_i32, %c0_i32_0 : i32, i32
  }
  func.func @transform_7(%arg0: i32) -> (i32, i32) {
    %c0_i32 = arith.constant 0 : i32
    %c0_i32_0 = arith.constant 0 : i32
    return %arg0, %c0_i32 : i32, i32
  }
}

</mosaic_0001>

<bundles_post_ra>
// kernel: tpu_custom_call.1
= control target key start
LH: loop header
LB: loop body
LE: loop exit
PB: predicated region body
PF: predicated region fallthrough
CT: control target
= control target key end

     0   :  { %12 = vsyncpa [#allocation3], 0  ;;  %s947_s0 = inlined_call_operand.hbm [shape: f32[8,128], index: 0, kind: input, shape index: {}]   ;;  %s948_s1 = inlined_call_operand.hbm [shape: bf16[128,256], index: 1, kind: input, shape index: {}]   ;;  %s949_s2 = inlined_call_operand.hbm [shape: f32[1,256], index: 2, kind: input, shape index: {}]   ;;  %s950_s3 = inlined_call_operand.hbm [shape: bf16[256,128], index: 3, kind: input, shape index: {}]   ;;  %s951_s4 = inlined_call_operand.vmem [shape: f32[1,128], index: 4, kind: input, shape index: {}]   ;;  %s952_s5 = inlined_call_operand.hbm [shape: bf16[128,128], index: 5, kind: input, shape index: {}]   ;;  %s953_s6 = inlined_call_operand.vmem [shape: f32[1,128], index: 6, kind: input, shape index: {}]   ;;  %s954_s7 = inlined_call_operand.hbm [shape: f32[8,128], index: 7, kind: output, shape index: {}]  }
   0x1   :  { %13 = vsyncpa [#allocation6], 0 }
   0x2   :  { %14 = vsyncpa [#allocation9], 0  ;;  %s31_s26 = sshll.u32 %s948_s1, 4  ;;  %s32_s26 = int_to_ptr.hbm [resolvable:$true] %s31_s26 }
   0x3   :  { %15 = vsyncpa [#allocation4], 0  ;;  %s873_s27 = smov [#allocation5]   ;;  %s55_s8 = sshll.u32 %s950_s3, 4  ;;  %s56_s8 = int_to_ptr.hbm [resolvable:$true] %s55_s8 }
   0x4   :  { %s33_s28 = sshll.u32 %s873_s27, 4  ;;  %s874_s9 = smov 128   ;;  %s34_s28 = int_to_ptr.vmem [resolvable:$true] %s33_s28 }
   0x5   :  { %s875_s10 = smov 8   ;;  %s876_s11 = smov [#allocation8]  }
   0x6   :  { %39 = dma.hbm_to_vmem [thread:$0]  %s32_s26, 2048, %s34_s28, [#allocation6], %s874_s9, %s874_s9, %s875_s10  }
   0x7   :  { %s57_s12 = sshll.u32 %s876_s11, 4  ;;  %s877_s13 = smov 64   ;;  %s58_s12 = int_to_ptr.vmem [resolvable:$true] %s57_s12 }
   0x8   :  { %s878_s14 = smov 4   ;;  %s21_s16 = sshll.u32 %s947_s0, 4  ;;  %s22_s16 = int_to_ptr.hbm [resolvable:$true] %s21_s16 }
   0x9   :  { %63 = dma.hbm_to_vmem [thread:$0]  %s56_s8, 2048, %s58_s12, [#allocation9], %s877_s13, %s877_s13, %s878_s14  }
   0xa   :  { %s879_s17 = smov [#allocation2]   ;;  %s45_s20 = sshll.u32 %s949_s2, 4  ;;  %s46_s20 = int_to_ptr.hbm [resolvable:$true] %s45_s20 }
   0xb   :  { %s23_s18 = sshll.u32 %s879_s17, 4  ;;  %s880_s21 = smov [#allocation7]   ;;  %s24_s18 = int_to_ptr.vmem [resolvable:$true] %s23_s18 }
   0xc   :  { %26 = dma.hbm_to_vmem [thread:$0]  %s22_s16, 128, %s24_s18, [#allocation3]  }
   0xd   :  { %s47_s22 = sshll.u32 %s880_s21, 4  ;;  %s70_s25 = sshll.u32 %s952_s5, 4  ;;  %s48_s22 = int_to_ptr.vmem [resolvable:$true] %s47_s22  ;;  %s71_s25 = int_to_ptr.hbm [resolvable:$true] %s70_s25 }
   0xe   :  { %50 = dma.hbm_to_vmem [thread:$0]  %s46_s20, 32, %s48_s22, [#allocation6]  }
   0xf   :  { %s881_s0 = smov [#allocation10]  }
  0x10   :  { %s72_s26 = sshll.u32 %s881_s0, 4  ;;  %s73_s26 = int_to_ptr.vmem [resolvable:$true] %s72_s26 }
  0x11   :  { %78 = dma.hbm_to_vmem [thread:$0]  %s71_s25, 1024, %s73_s26, [#allocation9], %s877_s13, %s877_s13, %s878_s14  }
  0x12   :  { %865 = dma.done.wait [#allocation3], 128  }
  0x13   :  { %866 = vsyncadd [#allocation3], 4294967168 }
  0x14   :  { %867 = dma.done.wait [#allocation6], 2080  }
  0x15   :  { %868 = vsyncadd [#allocation6], 4294965216 }
  0x16   :  { %869 = dma.done.wait [#allocation9], 3072  }
  0x17   :  { %870 = vsyncadd [#allocation9], 4294964224  ;;  %v563_v0 = vld [vmem:[#allocation5 + $0x70] sm:$0xf]  ;;  %v680_v1 = vld [vmem:[#allocation5 + $0x74] sm:$0xf0] }
  0x18   :  { %v679_v2 = vld [vmem:[#allocation5 + $0x74] sm:$0xf]  ;;  %v564_v3 = vor.u32 %v680_v1, %v563_v0  ;;  %v565_v4 = vld [vmem:[#allocation5 + $0x78] sm:$0xf0]  ;;  %v555_v5 = vld [vmem:[#allocation5 + $0x60] sm:$0xf] }
  0x19   :  { %v678_v6 = vld [vmem:[#allocation5 + $0x64] sm:$0xf0]  ;;  %v568_v7 = vor.u32 %v679_v2, %v565_v4  ;;  %v677_v8 = vld [vmem:[#allocation5 + $0x64] sm:$0xf]  ;;  %v557_v9 = vld [vmem:[#allocation5 + $0x68] sm:$0xf0] }
  0x1a   :  { %205 = vmatpush.bf16.msra.mxu0 %v564_v3  ;;  %v556_v10 = vor.u32 %v678_v6, %v555_v5  ;;  %v560_v11 = vor.u32 %v677_v8, %v557_v9  ;;  %v547_v12 = vld [vmem:[#allocation5 + $0x50] sm:$0xf]  ;;  %v676_v13 = vld [vmem:[#allocation5 + $0x54] sm:$0xf0]  ;;  %v675_v14 = vld [vmem:[#allocation5 + $0x54] sm:$0xf] }
  0x1b   :  { %218 = vmatpush.bf16.msra.mxu1 %v568_v7  ;;  %v549_v15 = vld [vmem:[#allocation5 + $0x58] sm:$0xf0]  ;;  %v548_v16 = vor.u32 %v676_v13, %v547_v12  ;;  %v539_v18 = vld [vmem:[#allocation5 + $0x40] sm:$0xf]  ;;  %v674_v19 = vld [vmem:[#allocation5 + $0x44] sm:$0xf0] }
  0x1c   :  { %v552_v17 = vor.u32 %v675_v14, %v549_v15  ;;  %v673_v20 = vld [vmem:[#allocation5 + $0x44] sm:$0xf]  ;;  %v541_v21 = vld [vmem:[#allocation5 + $0x48] sm:$0xf0]  ;;  %v540_v22 = vor.u32 %v674_v19, %v539_v18  ;;  %v688_v23 = vld [vmem:[#allocation8 + $0x38] sm:$0xff]  ;;  %s493_s9 = sshll.u32 %s954_s7, 4  ;;  %s494_s9 = int_to_ptr.hbm [resolvable:$true] %s493_s9 }
  0x1d   :  { %v696_v24 = vld [vmem:[#allocation8 + $0x78] sm:$0xff]  ;;  %v544_v25 = vor.u32 %v673_v20, %v541_v21  ;;  %v531_v26 = vld [vmem:[#allocation5 + $0x30] sm:$0xf]  ;;  %v671_v28 = vld [vmem:[#allocation5 + $0x34] sm:$0xf]  ;;  %367 = vmatpush.bf16.msra.mxu2 %v688_v23 }
  0x1e   :  { %206 = vmatpush.bf16.msra.mxu0 %v556_v10  ;;  %v672_v27 = vld [vmem:[#allocation5 + $0x34] sm:$0xf0]  ;;  %v533_v29 = vld [vmem:[#allocation5 + $0x38] sm:$0xf0]  ;;  %380 = vmatpush.bf16.msra.mxu3 %v696_v24  ;;  %v523_v34 = vld [vmem:[#allocation5 + $0x20] sm:$0xf] }
  0x1f   :  { %219 = vmatpush.bf16.msra.mxu1 %v560_v11  ;;  %v687_v30 = vld [vmem:[#allocation8 + $0x30] sm:$0xff]  ;;  %v532_v32 = vor.u32 %v672_v27, %v531_v26  ;;  %v536_v33 = vor.u32 %v671_v28, %v533_v29  ;;  %v670_v35 = vld [vmem:[#allocation5 + $0x24] sm:$0xf0]  ;;  %v669_v36 = vld [vmem:[#allocation5 + $0x24] sm:$0xf] }
  0x20   :  { %v695_v31 = vld [vmem:[#allocation8 + $0x70] sm:$0xff]  ;;  %v525_v37 = vld [vmem:[#allocation5 + $0x28] sm:$0xf0]  ;;  %v524_v40 = vor.u32 %v670_v35, %v523_v34  ;;  %v517_v45 = vld [vmem:[#allocation5 + $0x18] sm:$0xf0] }
  0x21   :  { %368 = vmatpush.bf16.msra.mxu2 %v687_v30  ;;  %v686_v38 = vld [vmem:[#allocation8 + $0x28] sm:$0xff]  ;;  %v528_v41 = vor.u32 %v669_v36, %v525_v37  ;;  %v668_v43 = vld [vmem:[#allocation5 + $0x14] sm:$0xf0]  ;;  %v667_v44 = vld [vmem:[#allocation5 + $0x14] sm:$0xf] }
  0x22   :  { %207 = vmatpush.bf16.msra.mxu0 %v548_v16  ;;  %381 = vmatpush.bf16.msra.mxu3 %v695_v31  ;;  %v694_v39 = vld [vmem:[#allocation8 + $0x68] sm:$0xff]  ;;  %v685_v46 = vld [vmem:[#allocation8 + $0x20] sm:$0xff]  ;;  %v520_v49 = vor.u32 %v667_v44, %v517_v45  ;;  %v684_v54 = vld [vmem:[#allocation8 + $0x18] sm:$0xff] }
  0x23   :  { %220 = vmatpush.bf16.msra.mxu1 %v552_v17  ;;  %v515_v42 = vld [vmem:[#allocation5 + $0x10] sm:$0xf]  ;;  %v693_v47 = vld [vmem:[#allocation8 + $0x60] sm:$0xff]  ;;  %v509_v53 = vld [vmem:[#allocation5 + $0x8] sm:$0xf0] }
  0x24   :  { %v516_v48 = vor.u32 %v668_v43, %v515_v42  ;;  %v507_v50 = vld [vmem:[#allocation5] sm:$0xf]  ;;  %v666_v51 = vld [vmem:[#allocation5 + $0x4] sm:$0xf0]  ;;  %v665_v52 = vld [vmem:[#allocation5 + $0x4] sm:$0xf] }
  0x25   :  { %369 = vmatpush.bf16.msra.mxu2 %v686_v38  ;;  %v692_v55 = vld [vmem:[#allocation8 + $0x58] sm:$0xff]  ;;  %v508_v56 = vor.u32 %v666_v51, %v507_v50  ;;  %v512_v58 = vor.u32 %v665_v52, %v509_v53  ;;  %v683_v59 = vld [vmem:[#allocation8 + $0x10] sm:$0xff]  ;;  %v682_v62 = vld [vmem:[#allocation8 + $0x8] sm:$0xff] }
  0x26   :  { %208 = vmatpush.bf16.msra.mxu0 %v540_v22  ;;  %382 = vmatpush.bf16.msra.mxu3 %v694_v39  ;;  %v101_v57 = vld [vmem:[#allocation2] sm:$0xff]  ;;  %v690_v63 = vld [vmem:[#allocation8 + $0x48] sm:$0xff]  ;;  %v681_v0 = vld [vmem:[#allocation8] sm:$0xff] }
  0x27   :  { %221 = vmatpush.bf16.msra.mxu1 %v544_v25  ;;  %v691_v60 = vld [vmem:[#allocation8 + $0x50] sm:$0xff]  ;;  %v102_v61 = vpack.c.bf16 %v101_v57, %v101_v57  ;;  %v689_v1 = vld [vmem:[#allocation8 + $0x40] sm:$0xff]  ;;  %v704_v2 = vld [vmem:[#allocation10 + $0x38] sm:$0xff] }
  0x28   :  { %v703_v3 = vld [vmem:[#allocation10 + $0x30] sm:$0xff]  ;;  %v702_v4 = vld [vmem:[#allocation10 + $0x28] sm:$0xff]  ;;  %v701_v5 = vld [vmem:[#allocation10 + $0x20] sm:$0xff] }
  0x29   :  { %370 = vmatpush.bf16.msra.mxu2 %v685_v46  ;;  %v700_v6 = vld [vmem:[#allocation10 + $0x18] sm:$0xff]  ;;  %v699_v8 = vld [vmem:[#allocation10 + $0x10] sm:$0xff]  ;;  %v698_v21 = vld [vmem:[#allocation10 + $0x8] sm:$0xff] }
  0x2a   :  { %209 = vmatpush.bf16.msra.mxu0 %v532_v32  ;;  %383 = vmatpush.bf16.msra.mxu3 %v693_v47  ;;  %v119_v7 = vld [vmem:[#allocation7] sm:$0x3]  ;;  %v697_v22 = vld [vmem:[#allocation10] sm:$0xff]  ;;  %v715_v23 = vld [vmem:[%s951_s4] ss:$0 sm:$0xff]  ;;  %s882_s4 = smov [#allocation11]  }
  0x2b   :  { %222 = vmatpush.bf16.msra.mxu1 %v536_v33  ;;  %v121_v9 = vperm.slane %v119_v7, 0  ;;  %v122_v10 = vperm.slane %v119_v7, 1  ;;  %v716_v32 = vld [vmem:[%s953_s6] ss:$0 sm:$0xff]  ;;  %s491_s29 = sshll.u32 %s882_s4, 4  ;;  %s492_s29 = int_to_ptr.vmem [resolvable:$true] %s491_s29 }
  0x2d   :  { %371 = vmatpush.bf16.msra.mxu2 %v684_v54 }
  0x2e   :  { %210 = vmatpush.bf16.msra.mxu0 %v524_v40  ;;  %384 = vmatpush.bf16.msra.mxu3 %v692_v55 }
  0x2f   :  { %223 = vmatpush.bf16.msra.mxu1 %v528_v41 }
  0x31   :  { %372 = vmatpush.bf16.msra.mxu2 %v683_v59 }
  0x32   :  { %211 = vmatpush.bf16.msra.mxu0 %v516_v48  ;;  %385 = vmatpush.bf16.msra.mxu3 %v691_v60 }
  0x33   :  { %224 = vmatpush.bf16.msra.mxu1 %v520_v49 }
  0x35   :  { %373 = vmatpush.bf16.msra.mxu2 %v682_v62 }
  0x36   :  { %212 = vmatpush.bf16.msra.mxu0 %v508_v56  ;;  %386 = vmatpush.bf16.msra.mxu3 %v690_v63 }
  0x37   :  { %225 = vmatpush.bf16.msra.mxu1 %v512_v58 }
  0x39   :  { %213 = vmatmul.bf16.vlgmr.msra.gmra.mxu0 %v102_v61  ;;  %374 = vmatpush.bf16.msra.mxu2 %v681_v0 }
  0x3a   :  { %226 = vmatmul.bf16.vlgmr.msra.gmra.mxu1 %v102_v61  ;;  %387 = vmatpush.bf16.msra.mxu3 %v689_v1 }
  0x3b   :  { %463 = vmatpush.bf16.msrb.mxu0 %v704_v2 }
  0x3f   :  { %464 = vmatpush.bf16.msrb.mxu0 %v703_v3 }
  0x43   :  { %465 = vmatpush.bf16.msrb.mxu0 %v702_v4 }
  0x47   :  { %466 = vmatpush.bf16.msrb.mxu0 %v701_v5 }
  0x4b   :  { %467 = vmatpush.bf16.msrb.mxu0 %v700_v6 }
  0x4f   :  { %468 = vmatpush.bf16.msrb.mxu0 %v699_v8 }
  0x53   :  { %469 = vmatpush.bf16.msrb.mxu0 %v698_v21 }
  0x57   :  { %470 = vmatpush.bf16.msrb.mxu0 %v697_v22 }
  0xb6   :  { %v214_v11 = vpop.f32.mrf.mxu0 }
  0xb7   :  { %v215_v12 = vadd.f32 %v214_v11, %v121_v9  ;;  %v227_v13 = vpop.f32.mrf.mxu1 }
  0xb8   :  { %v228_v14 = vadd.f32 %v227_v13, %v122_v10 }
  0xb9   :  { %v231_v15 = vmax.f32 %v215_v12, 0.0 }
  0xba   :  { %v232_v16 = vmax.f32 %v228_v14, 0.0 }
  0xbb   :  { %v233_v17 = vpack.c.bf16 %v231_v15, %v231_v15 }
  0xbc   :  { %v234_v18 = vpack.c.bf16 %v232_v16, %v232_v16 }
  0xbd   :  { %375 = vmatmul.bf16.vlgmr.msra.gmra.mxu2 %v233_v17 }
  0xbe   :  { %388 = vmatmul.bf16.vlgmr.msra.gmra.mxu3 %v234_v18  ;;  %v216_v19 = vpop.f32.mrf.mxu0 }
  0xbf   :  { %v229_v20 = vpop.f32.mrf.mxu1 }
 0x140   :  { %v376_v24 = vpop.f32.mrf.mxu2 }
 0x141   :  { %v377_v25 = vadd.f32 %v715_v23, %v376_v24  ;;  %v389_v26 = vpop.f32.mrf.mxu3 }
 0x143   :  { %v390_v27 = vadd.f32 %v389_v26, %v377_v25 }
 0x145   :  { %v393_v28 = vmax.f32 %v390_v27, 0.0 }
 0x147   :  { %v394_v29 = vpack.c.bf16 %v393_v28, %v393_v28 }
 0x148   :  { %v378_v30 = vpop.f32.mrf.mxu2 }
 0x149   :  { %v391_v31 = vpop.f32.mrf.mxu3  ;;  %471 = vmatmul.bf16.vlgmr.msrb.gmra.mxu0 %v394_v29 }
 0x1c6   :  { %v472_v33 = vpop.f32.mrf.mxu0 }
 0x1c7   :  { %v473_v34 = vadd.f32 %v716_v32, %v472_v33 }
 0x1c9   :  { %476 = vmax.xlane.f32.xlu0 %v473_v34 }
 0x1ce   :  { %v474_v35 = vpop.f32.mrf.mxu0 }
 0x23c   :  { %v477_v36 = vpop.xlane.xlu0 %476 }
 0x23d   :  { %v478_v37 = vsub.f32 %v473_v34, %v477_v36 }
 0x23f   :  { %v479_v38 = vmul.f32 1.442695, %v478_v37 }
 0x241   :  { %717 = vpow2.f32 %v479_v38 }
 0x247   :  { %v718_v39 = vpop.eup %717 }
 0x248   :  { %481 = vadd.xlane.f32.xlu0 %v718_v39 }
 0x2bb   :  { %v482_v40 = vpop.xlane.xlu0 %481 }
 0x2bc   :  { %719 = vrcp.f32 %v482_v40 }
 0x2c2   :  { %v720_v41 = vpop.eup %719 }
 0x2c3   :  { %v484_v42 = vmul.f32 %v720_v41, %v718_v39 }
 0x2c5   :  { %485 = vst [vmem:[#allocation11] sm:$0xff] %v484_v42 }
 0x2c6   :  { %496 = dma.vmem_to_hbm [thread:$0]  %s492_s29, 128, %s494_s9, [#allocation4]  }
 0x2c7   :  { %871 = dma.done.wait [#allocation4], 128  }
 0x2c8   :  { %872 = vsyncadd [#allocation4], 4294967168 }
 0x2c9   :  { %501 = vsyncpa [#allocation3], 1 }
 0x2ca   :  { %502 = vsyncpa [#allocation6], 1 }
 0x2cb   :  { %503 = vsyncpa [#allocation9], 1 }
 0x2cc   :  { %504 = vsyncpa [#allocation4], 1 }

</bundles_post_ra>
